<compile_context>
chip_gen: v7x
topology: tpu7x:2x2x1
jax: 0.10.0
libtpu: 0.0.40
codegen_flags: <defaults>
</compile_context>

<pallas_src>
import functools

import numpy as np
import jax
import jax.numpy as jnp
from jax import lax
from jax.experimental import pallas as pl
from jax.experimental.pallas import tpu as pltpu

ALPHA = 0.85
GAMMA = 1.5          # kernels specialize (1-pt)**1.5 as (1-pt)*sqrt(1-pt)
LANES = 128
FOLD = 64            # rows of the per-tile partial-sum slab (8 f32 vregs)
_VMEM_LIMIT = 32 * 1024 * 1024


def _focal_values(x, t, binary_targets):
    """Elementwise focal loss for f32 logits x and f32 targets t."""
    # Numerically stable binary_cross_entropy_with_logits (reduction='none'):
    #   bce = max(x, 0) - x*t + log1p(exp(-|x|))
    e = jnp.exp(-jnp.abs(x))                                   # EUP
    bce = jnp.maximum(x, 0.0) - x * t + jnp.log1p(e)

    if binary_targets:
        # For t in {0,1}:  1 - exp(-bce) == where(sign agrees, e, 1) / (1+e).
        # Formed directly (not as 1 - pt) for accuracy near pt -> 1; the
        # approximate EUP reciprocal replaces the f32 divide (review item).
        agree = (x >= 0.0) == (t >= 0.5)
        one_minus_pt = jnp.where(agree, e, 1.0) * pl.reciprocal(
            1.0 + e, approx=True)
    else:
        # Generic path (soft labels): pt = exp(-bce); clamp so sqrt stays NaN-free.
        one_minus_pt = jnp.maximum(1.0 - jnp.exp(-bce), 0.0)

    # (1 - pt) ** 1.5 == (1 - pt) * sqrt(1 - pt),  one_minus_pt >= 0.
    return ALPHA * (one_minus_pt * jnp.sqrt(one_minus_pt)) * bce


def _focal_tile_kernel(x_ref, t_ref, partial_ref, *, rows, tile_rows,
                       binary_targets):
    x = x_ref[...].astype(jnp.float32)
    t = t_ref[...].astype(jnp.float32)     # in-kernel cast (native-dtype input)
    focal = _focal_values(x, t, binary_targets)

    if rows % tile_rows:
        # Last tile is partial: Pallas supplies garbage for out-of-bounds rows.
        # Mask by global row index (statically omitted when rows % tile == 0;
        # otherwise the iota+cmp+select is VALU filler under the EUP-bound chain).
        row = lax.broadcasted_iota(jnp.int32, focal.shape, 0)
        focal = jnp.where(pl.program_id(0) * tile_rows + row < rows,
                          focal, 0.0)

    # Fold (tile_rows, 128) -> (FOLD, 128): 8 independent accumulator vregs,
    # pure vector adds, no cross-lane reduce on the per-tile critical path.
    partial_ref[...] = focal.reshape(tile_rows // FOLD, FOLD, LANES).sum(axis=0)


def _focal_small_kernel(x_ref, t_ref, out_ref, *, inv_total, binary_targets):
    focal = _focal_values(x_ref[...].astype(jnp.float32),
                          t_ref[...].astype(jnp.float32), binary_targets)
    # Single invocation: one XLU cross-lane reduce is free here; fold the mean
    # in so the wrapper needs no extra reduce/divide ops.
    out_ref[0, 0] = jnp.sum(focal) * inv_total


def _round_up(a, b):
    return -(-a // b) * b


def focal_loss(logits, targets, *, tile_rows=4096, small_rows=512,
               binary_targets=True):
    """Mean focal loss, alpha=0.85, gamma=1.5 (PyTorch FocalLoss.forward).

    binary_targets=True assumes targets in {0, 1} (the telco-churn use case)
    and enables the cheaper pt formula; pass False for soft labels.
    """
    assert logits.shape == targets.shape
    total = int(np.prod(logits.shape))

    if targets.dtype == jnp.bool_:
        targets = targets.astype(jnp.int8)   # 1-byte stream; cast to f32 in-kernel

    # Free flatten; only the ragged (<128-element) lane tail is padded, with
    # values that contribute an exact 0 to the focal sum (logits=100, t=1).
    x = jnp.ravel(logits)
    t = jnp.ravel(targets)
    pad = (-total) % LANES
    if pad:
        x = jnp.pad(x, (0, pad), constant_values=100.0)
        t = jnp.pad(t, (0, pad), constant_values=1)
    rows = (total + pad) // LANES
    x = x.reshape(rows, LANES)
    t = t.reshape(rows, LANES)

    if rows <= small_rows or rows < FOLD:
        # Latency-bound fast path: whole slab in VMEM, full in-kernel reduction
        # to a (1,1) SMEM scalar (mean included).
        out = pl.pallas_call(
            functools.partial(_focal_small_kernel, inv_total=1.0 / total,
                              binary_targets=binary_targets),
            out_shape=jax.ShapeDtypeStruct((1, 1), jnp.float32),
            in_specs=[pl.BlockSpec(memory_space=pltpu.MemorySpace.VMEM),
                      pl.BlockSpec(memory_space=pltpu.MemorySpace.VMEM)],
            out_specs=pl.BlockSpec(memory_space=pltpu.MemorySpace.SMEM),
        )(x, t)
        return out[0, 0]

    # Tiled path.  tr is a multiple of FOLD (also satisfies bf16/int8 sublane
    # tiling) and is capped at ~rows/2 so the grid always has >= 2 tiles.
    half_rows = -(-rows // 2)
    tr = min(int(tile_rows), _round_up(half_rows, FOLD))
    tr = max(FOLD, (tr // FOLD) * FOLD)
    num_tiles = -(-rows // tr)

    partials = pl.pallas_call(
        functools.partial(_focal_tile_kernel, rows=rows, tile_rows=tr,
                          binary_targets=binary_targets),
        out_shape=jax.ShapeDtypeStruct((num_tiles * FOLD, LANES), jnp.float32),
        grid=(num_tiles,),
        in_specs=[
            # If xprof ever shows exposed DMA at tile boundaries, add
            # pipeline_mode=pl.Buffered(3) to these two specs.
            pl.BlockSpec((tr, LANES), lambda i: (i, 0)),
            pl.BlockSpec((tr, LANES), lambda i: (i, 0)),
        ],
        out_specs=pl.BlockSpec((FOLD, LANES), lambda i: (i, 0)),
        compiler_params=pltpu.CompilerParams(
            dimension_semantics=("parallel",),
            vmem_limit_bytes=_VMEM_LIMIT,
        ),
    )(x, t)

    # Tree-like final reduce over tiny f32 partials + mean over the TRUE count
    # (pad / masked rows contributed exactly zero).
    return jnp.sum(partials) * (1.0 / total)


def focal_loss_ref(logits, targets):
    x = logits.astype(jnp.float32)
    t = targets.astype(jnp.float32)
    bce = jnp.maximum(x, 0.0) - x * t + jnp.log1p(jnp.exp(-jnp.abs(x)))
    pt = jnp.exp(-bce)
    return jnp.mean(ALPHA * (1.0 - pt) ** GAMMA * bce)


if __name__ == "__main__":
    key = jax.random.PRNGKey(0)
    ks = jax.random.split(key, 10)

    def check(out, ref, rtol):
        np.testing.assert_allclose(np.asarray(out), np.asarray(ref),
                                   rtol=rtol, atol=1e-6)

    # The binary-target path uses the approximate EUP reciprocal (review item),
    # so it is checked with a loose tolerance; the generic path is exact math.
    APPROX_RTOL = 1e-2
    EXACT_RTOL = 1e-4

    # 1) Lane-exact slab, f32 {0,1} targets -> single-invocation fast path.
    l1 = jax.random.normal(ks[0], (32, 128), jnp.float32) * 2.0
    t1 = (jax.random.uniform(ks[1], (32, 128)) < 0.3).astype(jnp.float32)
    o1 = jax.block_until_ready(focal_loss(l1, t1))
    check(o1, focal_loss_ref(l1, t1), APPROX_RTOL)

    # 2) Churn-shaped per-sample logits (batch, 1) -> fast path, 2 rows.
    l2 = jax.random.normal(ks[2], (256, 1), jnp.float32) * 3.0
    t2 = (jax.random.uniform(ks[3], (256, 1)) < 0.26).astype(jnp.float32)
    o2 = jax.block_until_ready(focal_loss(l2, t2))
    check(o2, focal_loss_ref(l2, t2), APPROX_RTOL)

    # 3) Ragged total (77*3 = 231, not a multiple of 128) -> benign lane pad.
    l3 = jax.random.normal(ks[4], (77, 3), jnp.float32)
    t3 = (jax.random.uniform(ks[5], (77, 3)) < 0.5).astype(jnp.float32)
    o3 = jax.block_until_ready(focal_loss(l3, t3))
    check(o3, focal_loss_ref(l3, t3), APPROX_RTOL)

    # 4) Tiled multi-tile path (forced), int8 targets, ragged last tile mask.
    l4 = jax.random.normal(ks[6], (80, 128), jnp.float32)
    t4 = (jax.random.uniform(ks[7], (80, 128)) < 0.5).astype(jnp.int8)
    o4 = jax.block_until_ready(focal_loss(l4, t4, tile_rows=64, small_rows=0))
    check(o4, focal_loss_ref(l4, t4), APPROX_RTOL)

    # 5) Soft labels -> generic exp(-bce) path (exact division / exp).
    l5 = jax.random.normal(ks[8], (16, 128), jnp.float32)
    t5 = jax.random.uniform(ks[9], (16, 128))
    o5 = jax.block_until_ready(focal_loss(l5, t5, binary_targets=False))
    check(o5, focal_loss_ref(l5, t5), EXACT_RTOL)

    print("KERNEL_OK")
</pallas_src>

<mosaic_0001>
module attributes {stable_mosaic.version = 11 : i64} {
  func.func @_focal_small_kernel(%arg0: memref<32x128xf32, #tpu.memory_space<vmem>>, %arg1: memref<32x128xf32, #tpu.memory_space<vmem>>, %arg2: memref<1x1xf32, #tpu.memory_space<smem>>) attributes {dimension_semantics = [], scalar_prefetch = 0 : i64, scratch_operands = 0 : i64, tpu.core_type = #tpu.core_type<tc>} {
    %c0 = arith.constant 0 : index
    %c0_0 = arith.constant 0 : index
    %0 = vector.load %arg0[%c0, %c0_0] : memref<32x128xf32, #tpu.memory_space<vmem>>, vector<32x128xf32>
    %c0_1 = arith.constant 0 : index
    %c0_2 = arith.constant 0 : index
    %1 = vector.load %arg1[%c0_1, %c0_2] : memref<32x128xf32, #tpu.memory_space<vmem>>, vector<32x128xf32>
    %2 = math.absf %0 : vector<32x128xf32>
    %cst = arith.constant 0.000000e+00 : f32
    %3 = vector.broadcast %cst : f32 to vector<32x128xf32>
    %4 = arith.subf %3, %2 : vector<32x128xf32>
    %5 = math.exp %4 : vector<32x128xf32>
    %cst_3 = arith.constant 0.000000e+00 : f32
    %6 = vector.broadcast %cst_3 : f32 to vector<32x128xf32>
    %7 = arith.maximumf %0, %6 : vector<32x128xf32>
    %8 = arith.mulf %0, %1 : vector<32x128xf32>
    %9 = arith.subf %7, %8 : vector<32x128xf32>
    %10 = math.log1p %5 : vector<32x128xf32>
    %11 = arith.addf %9, %10 : vector<32x128xf32>
    %cst_4 = arith.constant 0.000000e+00 : f32
    %12 = vector.broadcast %cst_4 : f32 to vector<32x128xf32>
    %13 = arith.cmpf oge, %0, %12 : vector<32x128xf32>
    %cst_5 = arith.constant 5.000000e-01 : f32
    %14 = vector.broadcast %cst_5 : f32 to vector<32x128xf32>
    %15 = arith.cmpf oge, %1, %14 : vector<32x128xf32>
    %16 = arith.xori %13, %15 : vector<32x128xi1>
    %cst_6 = arith.constant dense<true> : vector<32x128xi1>
    %17 = arith.xori %16, %cst_6 : vector<32x128xi1>
    %cst_7 = arith.constant 1.000000e+00 : f32
    %18 = vector.broadcast %cst_7 : f32 to vector<32x128xf32>
    %19 = arith.select %17, %5, %18 : vector<32x128xi1>, vector<32x128xf32>
    %cst_8 = arith.constant 1.000000e+00 : f32
    %20 = vector.broadcast %cst_8 : f32 to vector<32x128xf32>
    %21 = arith.addf %20, %5 : vector<32x128xf32>
    %22 = tpu.reciprocal %21 {approx = true} : vector<32x128xf32> -> vector<32x128xf32>
    %23 = arith.mulf %19, %22 : vector<32x128xf32>
    %24 = math.sqrt %23 : vector<32x128xf32>
    %25 = arith.mulf %23, %24 : vector<32x128xf32>
    %cst_9 = arith.constant 8.500000e-01 : f32
    %26 = vector.broadcast %cst_9 : f32 to vector<32x128xf32>
    %27 = arith.mulf %26, %25 : vector<32x128xf32>
    %28 = arith.mulf %27, %11 : vector<32x128xf32>
    %29 = vector.shape_cast %28 : vector<32x128xf32> to vector<1x32x128xf32>
    %cst_10 = arith.constant dense<0.000000e+00> : vector<1xf32>
    %30 = vector.multi_reduction <add>, %29, %cst_10 [1, 2] : vector<1x32x128xf32> to vector<1xf32>
    %31 = vector.shape_cast %30 : vector<1xf32> to vector<1x1x1xf32>
    %32 = vector.extract %31[0, 0, 0] : f32 from vector<1x1x1xf32>
    %cst_11 = arith.constant 2.44140625E-4 : f32
    %33 = arith.mulf %32, %cst_11 : f32
    %c0_12 = arith.constant 0 : index
    %c0_13 = arith.constant 0 : index
    %34 = memref.load %arg2[%c0_12, %c0_13] : memref<1x1xf32, #tpu.memory_space<smem>>
    memref.store %33, %arg2[%c0_12, %c0_13] : memref<1x1xf32, #tpu.memory_space<smem>>
    return
  }
}

</mosaic_0001>

<bundles_post_ra>
// kernel: tpu_custom_call.1
= control target key start
LH: loop header
LB: loop body
LE: loop exit
PB: predicated region body
PF: predicated region fallthrough
CT: control target
= control target key end

     0   :  { %7 = vsyncpa [#allocation3], 0  ;;  %s525_s0 = inlined_call_operand.hbm [shape: f32[32,128], index: 0, kind: input, shape index: {}]   ;;  %s526_s1 = inlined_call_operand.hbm [shape: f32[32,128], index: 1, kind: input, shape index: {}]   ;;  %s527_s2 = inlined_call_operand.hbm [shape: f32[1,1], index: 2, kind: output, shape index: {}]  }
   0x1   :  { %8 = vsyncpa [#allocation6], 0 }
   0x2   :  { %9 = vsyncpa [#allocation4], 0  ;;  %s318_s9 = smov [#allocation2]   ;;  %s258_s13 = scalar_lea.hbm %s525_s0, 512 }
   0x3   :  { %s15_s10 = sshll.u32 %s318_s9, 4  ;;  %p259_p0 = scmp.ne.s32.totalorder %s525_s0, %s258_s13  ;;  %s16_s10 = int_to_ptr.vmem [resolvable:$true] %s15_s10 }
   0x4   :  { %p262_p1 = scmp.lt.u32.totalorder %s258_s13, %s525_s0 }
   0x6   :  { %p264_p2 = pnand %p262_p1, %p259_p0 }
   0x8   :  { %267 = shalt.err (!%p264_p2)
}
   0x9   :  { %s268_s18 = scalar_lea.vmem %s16_s10, 512  ;;  %p273_p4 = scmp.lt.s32.totalorder %s16_s10, %s16_s10 }
   0xa   :  { %p269_p3 = scmp.ne.s32.totalorder %s16_s10, %s268_s18  ;;  %p274_p5 = scmp.lt.s32.totalorder %s268_s18, %s268_s18 }
   0xc   :  { %p275_p6 = por %p274_p5, %p273_p4 }
   0xe   :  { %p276_p7 = pnand %p275_p6, %p269_p3 }
  0x10   :  { %279 = shalt.err (!%p276_p7)
}
  0x11   :  { %s319_s19 = smov 128   ;;  %s320_s20 = smov 8  }
  0x12   :  { %21 = dma.hbm_to_vmem [thread:$0]  %s525_s0, 512, %s16_s10, [#allocation3], %s319_s19, %s319_s19, %s320_s20  }
  0x13   :  { %s321_s23 = smov [#allocation5]   ;;  %s280_s27 = scalar_lea.hbm %s526_s1, 512 }
  0x14   :  { %s27_s24 = sshll.u32 %s321_s23, 4  ;;  %p281_p8 = scmp.ne.s32.totalorder %s526_s1, %s280_s27  ;;  %s28_s24 = int_to_ptr.vmem [resolvable:$true] %s27_s24 }
  0x15   :  { %p284_p9 = scmp.lt.u32.totalorder %s280_s27, %s526_s1 }
  0x17   :  { %p286_p10 = pnand %p284_p9, %p281_p8 }
  0x19   :  { %289 = shalt.err (!%p286_p10)
}
  0x1a   :  { %s290_s4 = scalar_lea.vmem %s28_s24, 512  ;;  %p295_p12 = scmp.lt.s32.totalorder %s28_s24, %s28_s24 }
  0x1b   :  { %p291_p11 = scmp.ne.s32.totalorder %s28_s24, %s290_s4  ;;  %p296_p13 = scmp.lt.s32.totalorder %s290_s4, %s290_s4 }
  0x1d   :  { %p297_p0 = por %p296_p13, %p295_p12 }
  0x1f   :  { %p298_p1 = pnand %p297_p0, %p291_p11 }
  0x21   :  { %301 = shalt.err (!%p298_p1)
}
  0x22   :  { %33 = dma.hbm_to_vmem [thread:$0]  %s526_s1, 512, %s28_s24, [#allocation6], %s319_s19, %s319_s19, %s320_s20  }
  0x23   :  { %312 = dma.done.wait [#allocation3], 512  }
  0x24   :  { %313 = vsyncadd [#allocation3], 4294966784 }
  0x25   :  { %314 = dma.done.wait [#allocation6], 512  }
  0x26   :  { %315 = vsyncadd [#allocation6], 4294966784  ;;  %v363_v0 = vld [vmem:[#allocation2] sm:$0xff]  ;;  %v365_v1 = vld [vmem:[#allocation2 + $0x8] sm:$0xff]  ;;  %vm322_vm12 = vmmov 1   ;;  %s302_s9 = scalar_lea.hbm %s527_s2, 16 }
  0x27   :  { %v367_v2 = vld [vmem:[#allocation2 + $0x10] sm:$0xff]  ;;  %v369_v3 = vld [vmem:[#allocation2 + $0x18] sm:$0xff]  ;;  %v48_v4 = vand.u32 2147483647, %v363_v0  ;;  %v49_v5 = vand.u32 2147483647, %v365_v1  ;;  %p303_p2 = scmp.ne.s32.totalorder %s527_s2, %s302_s9  ;;  %p306_p3 = scmp.lt.u32.totalorder %s302_s9, %s527_s2 }
  0x28   :  { %v50_v6 = vand.u32 2147483647, %v367_v2  ;;  %v51_v7 = vand.u32 2147483647, %v369_v3  ;;  %v44_v19 = vld [vmem:[#allocation5] sm:$0xff]  ;;  %v45_v21 = vld [vmem:[#allocation5 + $0x8] sm:$0xff] }
  0x29   :  { %v52_v8 = vsub.f32 0.0, %v48_v4  ;;  %v53_v9 = vsub.f32 0.0, %v49_v5  ;;  %v384_v23 = vld [vmem:[#allocation5 + $0x10] sm:$0xff]  ;;  %v387_v25 = vld [vmem:[#allocation5 + $0x18] sm:$0xff]  ;;  %vm116_vm0 = vcmp.ge.f32.partialorder %v363_v0, 0.0  ;;  %vm120_vm1 = vcmp.ge.f32.partialorder %v44_v19, 0.5  ;;  %p308_p4 = pnand %p306_p3, %p303_p2 }
  0x2a   :  { %v54_v10 = vsub.f32 0.0, %v50_v6  ;;  %v55_v11 = vsub.f32 0.0, %v51_v7  ;;  %vm117_vm2 = vcmp.ge.f32.partialorder %v365_v1, 0.0  ;;  %vm121_vm3 = vcmp.ge.f32.partialorder %v45_v21, 0.5  ;;  %vm124_vm8 = vmxor %vm116_vm0, %vm120_vm1 }
  0x2b   :  { %v56_v12 = vmul.f32 1.442695, %v52_v8  ;;  %v58_v13 = vmul.f32 1.442695, %v53_v9  ;;  %vm118_vm4 = vcmp.ge.f32.partialorder %v367_v2, 0.0  ;;  %vm122_vm5 = vcmp.ge.f32.partialorder %v384_v23, 0.5  ;;  %vm125_vm9 = vmxor %vm117_vm2, %vm121_vm3 }
  0x2c   :  { %v60_v14 = vmul.f32 1.442695, %v54_v10  ;;  %v62_v15 = vmul.f32 1.442695, %v55_v11  ;;  %vm119_vm6 = vcmp.ge.f32.partialorder %v369_v3, 0.0  ;;  %vm123_vm7 = vcmp.ge.f32.partialorder %v387_v25, 0.5  ;;  %vm126_vm10 = vmxor %vm118_vm4, %vm122_vm5 }
  0x2d   :  { %226 = vpow2.f32 %v56_v12  ;;  %vm127_vm11 = vmxor %vm119_vm6, %vm123_vm7  ;;  %v64_v35 = vmax.f32 %v363_v0, 0.0  ;;  %v68_v39 = vmul.f32 %v44_v19, %v363_v0  ;;  %v69_v43 = vmul.f32 %v45_v21, %v365_v1 }
  0x2e   :  { %228 = vpow2.f32 %v58_v13  ;;  %vm397_vm13 = vmxor %vm124_vm8, %vm322_vm12  ;;  %v65_v48 = vmax.f32 %v365_v1, 0.0  ;;  %v66_v49 = vmax.f32 %v367_v2, 0.0  ;;  %v67_v0 = vmax.f32 %v369_v3, 0.0 }
  0x2f   :  { %230 = vpow2.f32 %v60_v14  ;;  %vm401_vm14 = vmxor %vm125_vm9, %vm322_vm12  ;;  %v70_v1 = vmul.f32 %v384_v23, %v367_v2  ;;  %v71_v5 = vmul.f32 %v387_v25, %v369_v3  ;;  %v72_v6 = vsub.f32 %v64_v35, %v68_v39 }
  0x30   :  { %232 = vpow2.f32 %v62_v15  ;;  %vm406_vm15 = vmxor %vm126_vm10, %vm322_vm12  ;;  %v73_v15 = vsub.f32 %v65_v48, %v69_v43 }
  0x31   :  { %vm410_vm0 = vmxor %vm127_vm11, %vm322_vm12 }
  0x37   :  { %v375_v16 = vpop.eup %226 }
  0x38   :  { %v377_v17 = vpop.eup %228  ;;  %v76_v22 = vadd.f32 1.0, %v375_v16  ;;  %v79_v30 = vmul.f32 -0.5, %v375_v16  ;;  %v132_v33 = vsel %vm397_vm13, %v375_v16, 1.0  ;;  %v82_v50 = vand.u32 2147483647, %v375_v16 }
  0x39   :  { %v379_v18 = vpop.eup %230  ;;  %v85_v24 = vadd.f32 1.0, %v377_v17  ;;  %v88_v36 = vmul.f32 -0.5, %v377_v17  ;;  %v133_v37 = vsel %vm401_vm14, %v377_v17, 1.0  ;;  %v91_v54 = vand.u32 2147483647, %v377_v17 }
  0x3a   :  { %v381_v20 = vpop.eup %232  ;;  %v94_v26 = vadd.f32 1.0, %v379_v18  ;;  %234 = vlog2.f32 %v76_v22  ;;  %v97_v40 = vmul.f32 -0.5, %v379_v18  ;;  %v134_v41 = vsel %vm406_vm15, %v379_v18, 1.0 }
  0x3b   :  { %v103_v27 = vadd.f32 1.0, %v381_v20  ;;  %236 = vrcp.f32 %v76_v22  ;;  %v80_v44 = vadd.f32 1.0, %v79_v30  ;;  %v135_v45 = vsel %vm410_vm0, %v381_v20, 1.0 }
  0x3c   :  { %238 = vrcp.f32 %v85_v24  ;;  %v89_v53 = vadd.f32 1.0, %v88_v36  ;;  %v98_v57 = vadd.f32 1.0, %v97_v40  ;;  %v106_v58 = vmul.f32 -0.5, %v381_v20 }
  0x3d   :  { %240 = vrcp.f32 %v94_v26  ;;  %v81_v62 = vmul.f32 %v375_v16, %v80_v44  ;;  %v100_v63 = vand.u32 2147483647, %v379_v18  ;;  %vm452_vm1 = vcmp.lt.f32.partialorder %v82_v50, 0.0004427343 }
  0x3e   :  { %242 = vrcp.f32 %v103_v27  ;;  %v90_v7 = vmul.f32 %v377_v17, %v89_v53  ;;  %v109_v8 = vand.u32 2147483647, %v381_v20  ;;  %v99_v11 = vmul.f32 %v379_v18, %v98_v57 }
  0x3f   :  { %244 = vlog2.f32 %v85_v24  ;;  %v107_v12 = vadd.f32 1.0, %v106_v58  ;;  %vm464_vm2 = vcmp.lt.f32.partialorder %v91_v54, 0.0004427343  ;;  %vm468_vm3 = vcmp.lt.f32.partialorder %v100_v63, 0.0004427343 }
  0x40   :  { %246 = vlog2.f32 %v94_v26  ;;  %v74_v16 = vsub.f32 %v66_v49, %v70_v1  ;;  %v75_v17 = vsub.f32 %v67_v0, %v71_v5  ;;  %vm472_vm4 = vcmp.lt.f32.partialorder %v109_v8, 0.0004427343 }
  0x41   :  { %248 = vlog2.f32 %v103_v27  ;;  %v108_v22 = vmul.f32 %v381_v20, %v107_v12 }
  0x44   :  { %v235_v34 = vpop.eup %234 }
  0x45   :  { %v237_v38 = vpop.eup %236  ;;  %v78_v61 = vmul.f32 0.6931472, %v235_v34 }
  0x46   :  { %v239_v42 = vpop.eup %238  ;;  %v431_v46 = vmul.f32 %v237_v38, %v132_v33 }
  0x47   :  { %v241_v47 = vpop.eup %240  ;;  %v436_v51 = vmul.f32 %v239_v42, %v133_v37  ;;  %v84_v2 = vsel %vm452_vm1, %v81_v62, %v78_v61 }
  0x48   :  { %v243_v52 = vpop.eup %242  ;;  %v439_v55 = vmul.f32 %v241_v47, %v134_v41  ;;  %250 = vrsqrt.f32 %v431_v46  ;;  %v112_v23 = vadd.f32 %v84_v2, %v72_v6  ;;  %vm150_vm5 = vcmp.eq.f32.partialorder %v431_v46, inf }
  0x49   :  { %v245_v56 = vpop.eup %244  ;;  %v443_v59 = vmul.f32 %v243_v52, %v135_v45  ;;  %252 = vrsqrt.f32 %v436_v51  ;;  %vm152_vm6 = vcmp.eq.f32.partialorder %v431_v46, 0.0  ;;  %v153_v26 = vand.u32 2147483648, %v431_v46 }
  0x4a   :  { %v247_v60 = vpop.eup %246  ;;  %254 = vrsqrt.f32 %v439_v55  ;;  %v87_v9 = vmul.f32 0.6931472, %v245_v56  ;;  %vm157_vm7 = vcmp.eq.f32.partialorder %v436_v51, inf  ;;  %vm159_vm8 = vcmp.eq.f32.partialorder %v436_v51, 0.0 }
  0x4b   :  { %256 = vrsqrt.f32 %v443_v59  ;;  %v96_v10 = vmul.f32 0.6931472, %v247_v60  ;;  %v249_v3 = vpop.eup %248  ;;  %v160_v29 = vand.u32 2147483648, %v436_v51  ;;  %vm164_vm9 = vcmp.eq.f32.partialorder %v439_v55, inf }
  0x4c   :  { %v93_v18 = vsel %vm464_vm2, %v90_v7, %v87_v9  ;;  %v105_v25 = vmul.f32 0.6931472, %v249_v3  ;;  %vm166_vm10 = vcmp.eq.f32.partialorder %v439_v55, 0.0  ;;  %v167_v31 = vand.u32 2147483648, %v439_v55 }
  0x4d   :  { %v102_v21 = vsel %vm468_vm3, %v99_v11, %v96_v10  ;;  %vm171_vm11 = vcmp.eq.f32.partialorder %v443_v59, inf  ;;  %v174_v35 = vand.u32 2147483648, %v443_v59  ;;  %vm173_vm12 = vcmp.eq.f32.partialorder %v443_v59, 0.0 }
  0x4e   :  { %v111_v39 = vsel %vm472_vm4, %v108_v22, %v105_v25  ;;  %v113_v43 = vadd.f32 %v93_v18, %v73_v15  ;;  %v114_v48 = vadd.f32 %v102_v21, %v74_v16 }
  0x4f   :  { %v115_v53 = vadd.f32 %v111_v39, %v75_v17 }
  0x52   :  { %v251_v24 = vpop.eup %250 }
  0x53   :  { %v253_v27 = vpop.eup %252  ;;  %v149_v28 = vmul.f32 %v251_v24, %v431_v46 }
  0x54   :  { %v255_v30 = vpop.eup %254  ;;  %v156_v20 = vmul.f32 %v253_v27, %v436_v51 }
  0x55   :  { %v257_v32 = vpop.eup %256  ;;  %v151_v33 = vsel %vm150_vm5, %v431_v46, %v149_v28  ;;  %v163_v34 = vmul.f32 %v255_v30, %v439_v55 }
  0x56   :  { %v154_v36 = vsel %vm152_vm6, %v153_v26, %v151_v33  ;;  %v158_v37 = vsel %vm157_vm7, %v436_v51, %v156_v20  ;;  %v170_v38 = vmul.f32 %v257_v32, %v443_v59 }
  0x57   :  { %v161_v40 = vsel %vm159_vm8, %v160_v29, %v158_v37  ;;  %v165_v41 = vsel %vm164_vm9, %v439_v55, %v163_v34  ;;  %v176_v42 = vmul.f32 %v154_v36, %v431_v46 }
  0x58   :  { %v168_v44 = vsel %vm166_vm10, %v167_v31, %v165_v41  ;;  %v172_v45 = vsel %vm171_vm11, %v443_v59, %v170_v38  ;;  %v177_v47 = vmul.f32 %v161_v40, %v436_v51 }
  0x59   :  { %v175_v49 = vsel %vm173_vm12, %v174_v35, %v172_v45  ;;  %v178_v50 = vmul.f32 %v168_v44, %v439_v55  ;;  %v180_v52 = vmul.f32 0.85, %v176_v42 }
  0x5a   :  { %v179_v54 = vmul.f32 %v175_v49, %v443_v59  ;;  %v181_v56 = vmul.f32 0.85, %v177_v47 }
  0x5b   :  { %v182_v57 = vmul.f32 0.85, %v178_v50  ;;  %v184_v58 = vmul.f32 %v180_v52, %v112_v23 }
  0x5c   :  { %v183_v46 = vmul.f32 0.85, %v179_v54  ;;  %v185_v60 = vmul.f32 %v181_v56, %v113_v43 }
  0x5d   :  { %v186_v61 = vmul.f32 %v182_v57, %v114_v48 }
  0x5e   :  { %v187_v62 = vmul.f32 %v183_v46, %v115_v53  ;;  %v188_v63 = vadd.f32 %v185_v60, %v184_v58 }
  0x60   :  { %v189_v0 = vadd.f32 %v188_v63, %v186_v61 }
  0x62   :  { %v190_v1 = vadd.f32 %v189_v0, %v187_v62 }
  0x64   :  { %191 = vadd.xlane.f32.xlu0 %v190_v1 }
  0xf1   :  { %v192_v51 = vpop.xlane.xlu0 %191 }
  0xf2   :  { %v193_v4 = vrot.slane %v192_v51, 4 }
  0xf4   :  { %v194_v5 = vadd.f32 %v193_v4, %v192_v51 }
  0xf6   :  { %v195_v6 = vrot.slane %v194_v5, 2 }
  0xf8   :  { %v196_v55 = vadd.f32 %v195_v6, %v194_v5 }
  0xfa   :  { %v197_v7 = vrot.slane %v196_v55, 1 }
  0xfc   :  { %v198_v8 = vadd.f32 %v197_v7, %v196_v55 }
  0xfe   :  { %218 = vpush %v198_v8 }
 0x12f   :  { %s219_s1 = spop %218 }
 0x130   :  { %s200_s6 = smul.f32 0.00024414063, %s219_s1 }
 0x132   :  { %202 = sst [smem:[#allocation7]] %s200_s6 }
 0x133   :  { %311 = shalt.err (!%p308_p4)
}
 0x134   :  { %s323_s14 = smov [#allocation7]  }
 0x135   :  { %210 = dma.smem_to_hbm %s323_s14, 16, %s527_s2, [#allocation4]  }
 0x136   :  { %316 = dma.done.wait [#allocation4], 16  }
 0x137   :  { %317 = vsyncadd [#allocation4], 4294967280 }
 0x138   :  { %214 = sfence }
 0x139   :  { %215 = vsyncpa [#allocation3], 1 }
 0x13a   :  { %216 = vsyncpa [#allocation6], 1 }
 0x13b   :  { %217 = vsyncpa [#allocation4], 1 }

</bundles_post_ra>
